<compile_context>
chip_gen: v7x
topology: tpu7x:2x2x1
jax: 0.10.0
libtpu: 0.0.40
codegen_flags: <defaults>
</compile_context>

<pallas_src>
import jax
import jax.numpy as jnp
from jax import lax
from jax.experimental import pallas as pl
from jax.experimental.pallas import tpu as pltpu

_LANE = 128


def _round_up(n: int, m: int) -> int:
    return (n + m - 1) // m * m


def _cdiv(a: int, b: int) -> int:
    return (a + b - 1) // b


def _discriminator_kernel(x_ref, w_ref, b_ref, o_ref):
    """o(g, TB) = sigmoid(w(g, K) @ x(TB, K)^T + bias), f32 accumulation.

    Batch sits on the lane axis of the output (lane-dense (g, TB) store); for
    the repacked small-L path K == 128, so the MXU gets a full-width
    contraction and DMA rows are dense.
    """
    x = x_ref[...]                              # (TB, K), native dtype
    w = w_ref[...]                              # (g,  K), pre-cast to x dtype
    logits = lax.dot_general(
        w, x,
        dimension_numbers=(((1,), (1,)), ((), ())),
        preferred_element_type=jnp.float32,
    )                                           # (g, TB) f32
    logits = logits + b_ref[0]                  # scalar bias from SMEM
    o_ref[...] = jax.nn.sigmoid(logits).astype(o_ref.dtype)


def _pick_rows_tile(num_rows: int, minor: int, itemsize: int, *,
                    target_logical_bytes: int = 8 << 20,
                    max_padded_bytes_per_buffer: int = 8 << 20) -> int:
    """Rows-per-block tile, accounting for 128-lane padding of the minor dim.

    * VMEM cost per row uses round_up(minor, 128) (lane padding); per-buffer
      padded size is capped at 8 MiB so the double-buffered input stays
      <= 16 MiB — inside the explicit 32 MiB scoped-VMEM limit everywhere and
      far under v7x's 64 MiB physical VMEM.
    * ~8 MiB of logical HBM bytes per step keeps the ~0.35 us per-step
      pipeline overhead negligible even at v7x's ~3.2 TB/s.
    * If the whole (packed) batch would fit in one block but has >= 256 rows,
      split into two lane-aligned blocks so the "parallel" grid axis can shard
      across v7x's two TensorCores.
    """
    padded_row = _round_up(minor, _LANE) * itemsize
    logical_row = minor * itemsize
    rows = min(target_logical_bytes // logical_row,
               max_padded_bytes_per_buffer // padded_row)
    rows = max(int(rows), 1)
    if rows >= num_rows:
        if num_rows >= 2 * _LANE:
            return _round_up(_cdiv(num_rows, 2), _LANE)   # >= 2 grid steps
        return num_rows                                   # single full block
    return max((rows // _LANE) * _LANE, _LANE)


def _linear_sigmoid_call(x2d, w2d, b1d, rows_tile):
    """sigmoid(w2d @ x2d^T + b) as a batch-tiled, lane-dense pallas_call."""
    num_rows, minor = x2d.shape
    g = w2d.shape[0]
    grid = _cdiv(num_rows, rows_tile)     # ragged last block -> no jnp.pad copy
    return pl.pallas_call(
        _discriminator_kernel,
        out_shape=jax.ShapeDtypeStruct((g, num_rows), x2d.dtype),
        grid_spec=pltpu.PrefetchScalarGridSpec(
            num_scalar_prefetch=0,
            grid=(grid,),
            in_specs=[
                pl.BlockSpec((rows_tile, minor), lambda i: (i, 0)),   # x tile
                pl.BlockSpec((g, minor), lambda i: (0, 0)),           # weight
                pl.BlockSpec(memory_space=pltpu.MemorySpace.SMEM),    # bias
            ],
            out_specs=pl.BlockSpec((g, rows_tile), lambda i: (0, i)), # lane-dense
        ),
        compiler_params=pltpu.CompilerParams(
            dimension_semantics=("parallel",),
            vmem_limit_bytes=32 << 20,
        ),
    )(x2d, w2d, b1d)


@jax.jit
def discriminator_forward(x, weight, bias):
    """x: (B, L); weight: (1, L) [PyTorch nn.Linear layout]; bias: (1,).

    Returns sigmoid(x @ weight.T + bias), shape (B, 1), dtype of x.
    """
    B, L = x.shape
    w_row = jnp.asarray(weight).reshape(1, L).astype(x.dtype)   # cast once here
    b1d = jnp.asarray(bias, dtype=jnp.float32).reshape(1)       # scalar -> SMEM
    itemsize = x.dtype.itemsize

    g = _LANE // L if (L < _LANE and _LANE % L == 0) else 1
    if g > 1 and B % g == 0:
        # Lane-dense repack for small L: (B, L) -> (B//g, g*L) is a contiguous
        # row-major reshape (no HBM copy). Contract against a block-diagonal
        # (g, g*L) weight so the matmul is (g,128)x(128,TB) with no 128/L
        # lane-padding waste in VMEM.
        rows = B // g
        x_in = x.reshape(rows, g * L)
        w_in = jnp.kron(jnp.eye(g, dtype=w_row.dtype), w_row)    # (g, g*L)
        tile = _pick_rows_tile(rows, g * L, itemsize)
        out_packed = _linear_sigmoid_call(x_in, w_in, b1d, tile)  # (g, rows)
        # out_packed[j, i] is the logit of original row i*g + j -> un-interleave.
        return out_packed.T.reshape(B, 1)

    # General path (L >= 128, or batch not divisible by the packing factor).
    tile = _pick_rows_tile(B, L, itemsize)
    out_row = _linear_sigmoid_call(x, w_row, b1d, tile)           # (1, B)
    return out_row.reshape(B, 1)


if __name__ == "__main__":
    key = jax.random.PRNGKey(0)

    def init_params(k, input_length):
        kw, kb = jax.random.split(k)
        bound = 1.0 / (input_length ** 0.5)
        w = jax.random.uniform(kw, (1, input_length), jnp.float32, -bound, bound)
        b = jax.random.uniform(kb, (1,), jnp.float32, -bound, bound)
        return w, b

    def reference(x, w, b):
        logits = jnp.dot(x, w.T, precision=lax.Precision.HIGHEST) + b
        return jax.nn.sigmoid(logits)

    # (B, L) cases:
    #  (8, 8)     : tiny Discriminator(input_length=8) shape, single-block path
    #  (512, 8)   : lane-dense repack path (g=16), single block
    #  (2048, 16) : repack path (g=8), 2-step parallel grid
    #  (520, 256) : general path, ragged multi-block (no jnp.pad)
    for B, L in [(8, 8), (512, 8), (2048, 16), (520, 256)]:
        key, kp, kx = jax.random.split(key, 3)
        w, b = init_params(kp, L)
        x = jax.random.normal(kx, (B, L), jnp.float32)
        out = jax.block_until_ready(discriminator_forward(x, w, b))
        assert out.shape == (B, 1), (out.shape, B)
        ref = reference(x, w, b)
        err = float(jnp.max(jnp.abs(out - ref)))
        assert jnp.allclose(out, ref, atol=2e-3), (B, L, err)

    print("KERNEL_OK")
</pallas_src>

<mosaic_0001>
module attributes {stable_mosaic.version = 11 : i64} {
  func.func @_discriminator_kernel(%arg0: i32, %arg1: memref<8x8xf32, #tpu.memory_space<vmem>>, %arg2: memref<1x8xf32, #tpu.memory_space<vmem>>, %arg3: memref<1xf32, #tpu.memory_space<smem>>, %arg4: memref<1x8xf32, #tpu.memory_space<vmem>>) attributes {dimension_semantics = [#tpu.dimension_semantics<parallel>], iteration_bounds = array<i64: 1>, scalar_prefetch = 0 : i64, scratch_operands = 0 : i64, tpu.core_type = #tpu.core_type<tc>, window_params = [{transform_indices = @transform_0, window_bounds = array<i64: 8, 8>}, {pipeline_mode = #tpu.pipeline_mode<synchronous>, transform_indices = @transform_1, window_bounds = array<i64: 1, 8>}, {transform_indices = @transform_2, window_bounds = array<i64: 1>}, {transform_indices = @transform_3, window_bounds = array<i64: 1, 8>}]} {
    %c0 = arith.constant 0 : index
    %c0_0 = arith.constant 0 : index
    %0 = vector.load %arg1[%c0, %c0_0] : memref<8x8xf32, #tpu.memory_space<vmem>>, vector<8x8xf32>
    %c0_1 = arith.constant 0 : index
    %c0_2 = arith.constant 0 : index
    %1 = vector.load %arg2[%c0_1, %c0_2] : memref<1x8xf32, #tpu.memory_space<vmem>>, vector<1x8xf32>
    %cst = arith.constant dense<0.000000e+00> : vector<1x8xf32>
    %2 = tpu.matmul %1, %0, %cst {dimension_numbers = #tpu.dot_dimension_numbers<[1], [1], [0], [0], [0, 0, 1, 0], [], []>} : vector<1x8xf32>, vector<8x8xf32>, vector<1x8xf32> -> vector<1x8xf32>
    %c0_3 = arith.constant 0 : index
    %3 = memref.load %arg3[%c0_3] : memref<1xf32, #tpu.memory_space<smem>>
    %4 = vector.broadcast %3 : f32 to vector<1x8xf32>
    %5 = arith.addf %2, %4 : vector<1x8xf32>
    %6 = arith.negf %5 : vector<1x8xf32>
    %7 = math.exp %6 : vector<1x8xf32>
    %cst_4 = arith.constant 1.000000e+00 : f32
    %8 = vector.broadcast %cst_4 : f32 to vector<1x8xf32>
    %9 = arith.addf %8, %7 : vector<1x8xf32>
    %10 = arith.divf %8, %9 : vector<1x8xf32>
    %c0_5 = arith.constant 0 : index
    %c0_6 = arith.constant 0 : index
    %11 = vector.load %arg4[%c0_5, %c0_6] : memref<1x8xf32, #tpu.memory_space<vmem>>, vector<1x8xf32>
    tpu.vector_store %arg4[%c0_5, %c0_6], %10 {strides = array<i32>} : memref<1x8xf32, #tpu.memory_space<vmem>>, vector<1x8xf32>,
    return
  }
  func.func @transform_0(%arg0: i32) -> (i32, i32) {
    %c0_i32 = arith.constant 0 : i32
    %c0_i32_0 = arith.constant 0 : i32
    return %arg0, %c0_i32 : i32, i32
  }
  func.func @transform_1(%arg0: i32) -> (i32, i32) {
    %c0_i32 = arith.constant 0 : i32
    %c0_i32_0 = arith.constant 0 : i32
    %c0_i32_1 = arith.constant 0 : i32
    return %c0_i32, %c0_i32_0 : i32, i32
  }
  func.func @transform_2(%arg0: i32) -> i32 {
    %c0_i32 = arith.constant 0 : i32
    %c0_i32_0 = arith.constant 0 : i32
    return %c0_i32 : i32
  }
  func.func @transform_3(%arg0: i32) -> (i32, i32) {
    %c0_i32 = arith.constant 0 : i32
    %c0_i32_0 = arith.constant 0 : i32
    return %c0_i32, %arg0 : i32, i32
  }
}

</mosaic_0001>

<bundles_post_ra>
// kernel: discriminator_forward.1
= control target key start
LH: loop header
LB: loop body
LE: loop exit
PB: predicated region body
PF: predicated region fallthrough
CT: control target
= control target key end

     0   :  { %9 = vsyncpa [#allocation4], 0  ;;  %s252_s0 = inlined_call_operand.hbm [shape: f32[8,8], index: 0, kind: input, shape index: {}]   ;;  %s253_s1 = inlined_call_operand.vmem [shape: f32[1,8], index: 1, kind: input, shape index: {}]   ;;  %s254_s2 = inlined_call_operand.<no memory space> [shape: f32[1], index: 2, kind: input, shape index: {}]   ;;  %s255_s3 = inlined_call_operand.hbm [shape: f32[1,8], index: 3, kind: output, shape index: {}]  }
   0x1   :  { %10 = vsyncpa [#allocation5], 0  ;;  %s198_s12 = smov [#allocation3]   ;;  %s150_s16 = scalar_lea.hbm %s252_s0, 128 }
   0x2   :  { %s17_s13 = sshll.u32 %s198_s12, 4  ;;  %p151_p0 = scmp.ne.s32.totalorder %s252_s0, %s150_s16  ;;  %s18_s13 = int_to_ptr.vmem [resolvable:$true] %s17_s13 }
   0x3   :  { %p154_p1 = scmp.lt.u32.totalorder %s150_s16, %s252_s0 }
   0x5   :  { %p156_p2 = pnand %p154_p1, %p151_p0 }
   0x7   :  { %159 = shalt.err (!%p156_p2)
}
   0x8   :  { %s160_s21 = scalar_lea.vmem %s18_s13, 128  ;;  %p165_p4 = scmp.lt.s32.totalorder %s18_s13, %s18_s13 }
   0x9   :  { %p161_p3 = scmp.ne.s32.totalorder %s18_s13, %s160_s21  ;;  %p166_p5 = scmp.lt.s32.totalorder %s160_s21, %s160_s21 }
   0xb   :  { %p167_p6 = por %p166_p5, %p165_p4 }
   0xd   :  { %p168_p7 = pnand %p167_p6, %p161_p3 }
   0xf   :  { %171 = shalt.err (!%p168_p7)
}
  0x10   :  { %20 = dma.hbm_to_vmem [thread:$0]  %s252_s0, 128, %s18_s13, [#allocation4]  }
  0x11   :  { %194 = dma.done.wait [#allocation4], 128  }
  0x12   :  { %195 = vsyncadd [#allocation4], 4294967168  ;;  %v199_v0 = vmov 0.0   ;;  %vm200_vm0 = vmmov 0   ;;  %vm32_vm1 = vcmask 64512   ;;  %v28_v1 = vld [vmem:[#allocation3] sm:$0xff]  ;;  %v31_v3 = vstv %s254_s2 }
  0x13   :  { %137 = vmatprep.subr.mxu0 %v199_v0  ;;  %139 = vmatprep.mubr.msk.f32.mxu0 %vm200_vm0, %v199_v0  ;;  %v29_v2 = vld [vmem:[%s253_s1] sm:$0x1]  ;;  %s201_s0 = smov [#allocation6]   ;;  %vm115_vm2 = vcmask 57344  }
  0x14   :  { %138 = vmatpush3.xpose.msk.msra.mxu0 %vm32_vm1, %v28_v1  ;;  %s123_s28 = sshll.u32 %s201_s0, 4  ;;  %s124_s28 = int_to_ptr.vmem [resolvable:$true] %s123_s28 }
  0x15   :  { %s172_s1 = scalar_lea.vmem %s124_s28, 16  ;;  %s176_s29 = scalar_lea.vmem %s124_s28, 32 }
  0x16   :  { %p173_p8 = scmp.ne.s32.totalorder %s124_s28, %s172_s1  ;;  %p177_p9 = scmp.lt.s32.totalorder %s124_s28, %s124_s28 }
  0x17   :  { %140 = vmatmul.mubr.msk.f32.vlgmr.msra.gmra.mrb[0].mxu0 %vm32_vm1, %v29_v2  ;;  %p178_p10 = scmp.lt.s32.totalorder %s176_s29, %s172_s1 }
  0x19   :  { %p179_p11 = por %p178_p10, %p177_p9 }
  0x1b   :  { %p180_p12 = pnand %p179_p11, %p173_p8 }
  0xea   :  { %v105_v4 = vpop.f32.mrb[0].mxu0 }
  0xeb   :  { %v106_v5 = vadd.f32 %v105_v4, %v31_v3  ;;  %v141_v6 = vpop.f32.mrb[1].mxu0 }
  0xed   :  { %v134_v7 = vmul.f32 -1.442695, %v106_v5 }
  0xef   :  { %146 = vpow2.f32 %v134_v7 }
  0xf9   :  { %v147_v8 = vpop.eup %146 }
  0xfa   :  { %v112_v9 = vadd.f32 1.0, %v147_v8 }
  0xfc   :  { %148 = vrcp.f32 %v112_v9 }
 0x106   :  { %v149_v10 = vpop.eup %148 }
 0x107   :  { %116 = vst.msk [vmem:[#allocation6] sm:$0x1] %vm115_vm2, %v149_v10 }
 0x108   :  { %183 = shalt.err (!%p180_p12)
}
 0x109   :  { %s184_s4 = scalar_lea.hbm %s255_s3, 16 }
 0x10a   :  { %p185_p13 = scmp.ne.s32.totalorder %s255_s3, %s184_s4  ;;  %p188_p0 = scmp.lt.u32.totalorder %s184_s4, %s255_s3 }
 0x10c   :  { %p190_p1 = pnand %p188_p0, %p185_p13 }
 0x10e   :  { %193 = shalt.err (!%p190_p1)
}
 0x10f   :  { %126 = dma.vmem_to_hbm [thread:$0]  %s124_s28, 16, %s255_s3, [#allocation5]  }
 0x110   :  { %196 = dma.done.wait [#allocation5], 16  }
 0x111   :  { %197 = vsyncadd [#allocation5], 4294967280 }
 0x112   :  { %130 = vsyncpa [#allocation4], 1 }
 0x113   :  { %131 = vsyncpa [#allocation5], 1 }

</bundles_post_ra>
